<compile_context>
chip_gen: v5e
topology: v5e:2x2
jax: 0.10.0
libtpu: 0.0.40
codegen_flags: <defaults>
</compile_context>

<pallas_src>
import functools

import jax
import jax.numpy as jnp
from jax import lax
from jax.experimental import pallas as pl
from jax.experimental.pallas import tpu as pltpu


def _l2norm_kernel(x_ref, o_ref, *, eps):
    x = x_ref[...]
    # Reduce in f32 regardless of input dtype (bf16 tiles stay bf16 in VMEM).
    ss = jnp.sum(x * x, axis=-1, keepdims=True, dtype=jnp.float32)    # (tm, 1)
    inv = lax.rsqrt(ss + jnp.float32(eps))                            # (tm, 1)
    o_ref[...] = (x * inv).astype(o_ref.dtype)


def _sublane_pack(dtype):
    # Rows per packed 32-bit sublane group: 8 for f32, 16 for bf16, 32 for int8.
    return max(8, 32 // jnp.dtype(dtype).itemsize)


def _pick_tm(N, D, dtype, buffer_budget_bytes=16 << 20, row_cap=4096):
    """Largest row tile whose double-buffered in+out footprint fits the budget."""
    itemsize = jnp.dtype(dtype).itemsize
    pack = _sublane_pack(dtype)
    bytes_per_row = 4 * D * itemsize          # (in + out) x 2 pipeline buffers
    tm = max(pack, buffer_budget_bytes // max(bytes_per_row, 1))
    tm = min(tm, row_cap)
    n_up = pl.cdiv(N, pack) * pack            # rows after sublane rounding
    tm = min(tm, n_up)                        # never pad beyond what N needs
    if tm >= n_up and N > 2 * pack:
        # Keep >= 2 grid steps so v7x can shard rows across both TensorCores.
        tm = pl.cdiv(pl.cdiv(N, 2), pack) * pack
    return max(pack, (tm // pack) * pack)


def l2norm(x, eps=1e-10, tm=None):
    """Pallas L2Norm: x / sqrt(sum(x*x, dim=1) + eps), x of shape (N, D)."""
    N, D = x.shape
    if tm is None:
        tm = _pick_tm(N, D, x.dtype)
    pack = _sublane_pack(x.dtype)
    assert tm % pack == 0, "row tile must respect sublane packing"

    n_blocks = pl.cdiv(N, tm)
    N_pad = n_blocks * tm
    x_in = x if N_pad == N else jnp.pad(x, ((0, N_pad - N), (0, 0)))

    itemsize = jnp.dtype(x.dtype).itemsize
    kernel = functools.partial(_l2norm_kernel, eps=eps)
    out = pl.pallas_call(
        kernel,
        out_shape=jax.ShapeDtypeStruct((N_pad, D), x.dtype),
        grid_spec=pltpu.PrefetchScalarGridSpec(
            num_scalar_prefetch=0,
            grid=(n_blocks,),
            in_specs=[pl.BlockSpec((tm, D), lambda i: (i, 0))],
            out_specs=pl.BlockSpec((tm, D), lambda i: (i, 0)),
        ),
        compiler_params=pltpu.CompilerParams(
            dimension_semantics=("parallel",),
            vmem_limit_bytes=48 << 20,   # safe on v5e/v6e (128 MiB) and v7x (64 MiB)
        ),
        cost_estimate=pl.CostEstimate(
            flops=2 * N * D,
            transcendentals=N,
            bytes_accessed=2 * N * D * itemsize,
        ),
    )(x_in)
    return out if N_pad == N else out[:N]


if __name__ == "__main__":
    eps = 1e-10

    # Primary check: batch of 128-d descriptors (the shape networks.py uses).
    x = jax.random.normal(jax.random.PRNGKey(0), (8, 128), dtype=jnp.float32)
    out = jax.block_until_ready(l2norm(x, eps=eps))
    ref = x / jnp.sqrt(jnp.sum(x * x, axis=1) + eps)[:, None]
    assert out.shape == x.shape and out.dtype == x.dtype
    assert jnp.allclose(out, ref, atol=1e-5, rtol=1e-5)

    # Non-divisible-N path (exercises padding + tail slice).
    x2 = jax.random.normal(jax.random.PRNGKey(1), (13, 32), dtype=jnp.float32)
    out2 = jax.block_until_ready(l2norm(x2, eps=eps))
    ref2 = x2 / jnp.sqrt(jnp.sum(x2 * x2, axis=1) + eps)[:, None]
    assert out2.shape == x2.shape and out2.dtype == x2.dtype
    assert jnp.allclose(out2, ref2, atol=1e-5, rtol=1e-5)

    print("KERNEL_OK")
</pallas_src>

<mosaic_0001>
module attributes {stable_mosaic.version = 11 : i64} {
  func.func @_l2norm_kernel(%arg0: i32, %arg1: memref<8x128xf32, #tpu.memory_space<vmem>>, %arg2: memref<8x128xf32, #tpu.memory_space<vmem>>) attributes {dimension_semantics = [#tpu.dimension_semantics<parallel>], iteration_bounds = array<i64: 1>, scalar_prefetch = 0 : i64, scratch_operands = 0 : i64, tpu.core_type = #tpu.core_type<tc>, window_params = [{transform_indices = @transform_0, window_bounds = array<i64: 8, 128>}, {transform_indices = @transform_1, window_bounds = array<i64: 8, 128>}]} {
    %c0 = arith.constant 0 : index
    %c0_0 = arith.constant 0 : index
    %0 = vector.load %arg1[%c0, %c0_0] : memref<8x128xf32, #tpu.memory_space<vmem>>, vector<8x128xf32>
    %1 = arith.mulf %0, %0 : vector<8x128xf32>
    %cst = arith.constant dense<0.000000e+00> : vector<8xf32>
    %2 = vector.multi_reduction <add>, %1, %cst [1] : vector<8x128xf32> to vector<8xf32>
    %3 = vector.shape_cast %2 : vector<8xf32> to vector<8x1xf32>
    %cst_1 = arith.constant 1.000000e-10 : f32
    %4 = vector.broadcast %cst_1 : f32 to vector<8x1xf32>
    %5 = arith.addf %3, %4 : vector<8x1xf32>
    %6 = math.rsqrt %5 : vector<8x1xf32>
    %7 = vector.broadcast %6 : vector<8x1xf32> to vector<8x128xf32>
    %8 = arith.mulf %0, %7 : vector<8x128xf32>
    %c0_2 = arith.constant 0 : index
    %c0_3 = arith.constant 0 : index
    %9 = vector.load %arg2[%c0_2, %c0_3] : memref<8x128xf32, #tpu.memory_space<vmem>>, vector<8x128xf32>
    tpu.vector_store %arg2[%c0_2, %c0_3], %8 {strides = array<i32>} : memref<8x128xf32, #tpu.memory_space<vmem>>, vector<8x128xf32>,
    return
  }
  func.func @transform_0(%arg0: i32) -> (i32, i32) {
    %c0_i32 = arith.constant 0 : i32
    %c0_i32_0 = arith.constant 0 : i32
    return %arg0, %c0_i32 : i32, i32
  }
  func.func @transform_1(%arg0: i32) -> (i32, i32) {
    %c0_i32 = arith.constant 0 : i32
    %c0_i32_0 = arith.constant 0 : i32
    return %arg0, %c0_i32 : i32, i32
  }
}

</mosaic_0001>

<bundles_post_ra>
// kernel: tpu_custom_call.1
= control target key start
LH: loop header
LB: loop body
LE: loop exit
PB: predicated region body
PF: predicated region fallthrough
CT: control target
= control target key end

     0   :  { %6 = vsyncpa [#allocation3], 0  ;;  %s131_s0 = inlined_call_operand.hbm [shape: f32[8,128], index: 0, kind: input, shape index: {}]   ;;  %s132_s1 = inlined_call_operand.hbm [shape: f32[8,128], index: 1, kind: output, shape index: {}]  }
   0x1   :  { %7 = vsyncpa [#allocation4], 0  ;;  %s13_s8 = sshll.u32 %s131_s0, 4  ;;  %s113_s9 = smov [#allocation2]   ;;  %s14_s8 = int_to_ptr.hbm [resolvable:$true] %s13_s8 }
   0x2   :  { %s15_s10 = sshll.u32 %s113_s9, 4  ;;  %s16_s10 = int_to_ptr.vmem [resolvable:$true] %s15_s10 }
   0x3   :  { %18 = dma.hbm_to_vmem [thread:$0]  %s14_s8, 128, %s16_s10, [#allocation3]  }
   0x4   :  { %109 = dma.done.wait [#allocation3], 128  }
   0x5   :  { %110 = vsyncadd [#allocation3], 4294967168  ;;  %v23_v0 = vld [vmem:[#allocation2] sm:$0xff]  ;;  %s114_s0 = smov [#allocation5]   ;;  %s47_s14 = sshll.u32 %s132_s1, 4  ;;  %s48_s14 = int_to_ptr.hbm [resolvable:$true] %s47_s14 }
   0x6   :  { %v24_v1 = vmul.f32 %v23_v0, %v23_v0  ;;  %s45_s11 = sshll.u32 %s114_s0, 4  ;;  %s46_s11 = int_to_ptr.vmem [resolvable:$true] %s45_s11 }
   0x8   :  { %25 = vadd.xlane.f32.xlu0 %v24_v1 }
  0x7b   :  { %v26_v2 = vpop.xlane.xlu0 %25 }
  0x7c   :  { %v27_v3 = vadd.f32 1e-10, %v26_v2 }
  0x7e   :  { %59 = vrsqrt.f32 %v27_v3  ;;  %vm34_vm1 = vweird.f32 %v27_v3 }
  0x84   :  { %v60_v4 = vpop.eup %59 }
  0x85   :  { %v29_v5 = vmul.f32 %v60_v4, %v27_v3  ;;  %vm35_vm0 = vweird.f32 %v60_v4 }
  0x86   :  { %vm36_vm2 = vmor %vm34_vm1, %vm35_vm0 }
  0x87   :  { %v30_v6 = vmul.f32 %v60_v4, %v29_v5 }
  0x89   :  { %v31_v7 = vmul.f32 0.5, %v30_v6 }
  0x8b   :  { %v32_v8 = vsub.f32 1.5, %v31_v7 }
  0x8d   :  { %v33_v9 = vmul.f32 %v60_v4, %v32_v8 }
  0x8f   :  { %v37_v10 = vsel %vm36_vm2, %v60_v4, %v33_v9 }
  0x90   :  { %v38_v11 = vmul.f32 %v37_v10, %v23_v0 }
  0x92   :  { %39 = vst [vmem:[#allocation5] sm:$0xff] %v38_v11 }
  0x93   :  { %50 = dma.vmem_to_hbm [thread:$0]  %s46_s11, 128, %s48_s14, [#allocation4]  }
  0x94   :  { %111 = dma.done.wait [#allocation4], 128  }
  0x95   :  { %112 = vsyncadd [#allocation4], 4294967168 }
  0x96   :  { %55 = vsyncpa [#allocation3], 1 }
  0x97   :  { %56 = vsyncpa [#allocation4], 1 }

</bundles_post_ra>
